<compile_context>
chip_gen: v5e
topology: v5e:2x2
jax: 0.10.0
libtpu: 0.0.40
codegen_flags: <defaults>
</compile_context>

<pallas_src>
import functools

import jax
import jax.numpy as jnp
from jax.experimental import pallas as pl
from jax.experimental.pallas import tpu as pltpu

F = 8                       # autoencoder feature width
SAMPLES_PER_ROW = 128 // F  # 16 samples packed per 128-lane row


def _round_up(x, m):
    return ((x + m - 1) // m) * m


def _fused_autoencoder_kernel(x_ref, w_ref, b_ref, o_ref):
    # x_ref: [TR, 128]   flat input tile (16 samples x 8 features per row)
    # w_ref: [128, 128]  block-diagonal fused weight (16 copies of W_f), f32
    # b_ref: [1, 128]    fused bias tiled across the 16 sample groups, f32
    # o_ref: [TR, 128]   flat output tile
    x = x_ref[...].astype(jnp.float32)
    # Single MXU matmul per tile; block-diagonal weight applies the fused 8x8
    # map independently to each of the 16 sample groups in a row.
    y = jnp.dot(x, w_ref[...], preferred_element_type=jnp.float32)
    o_ref[...] = (y + b_ref[...]).astype(o_ref.dtype)


@functools.partial(jax.jit, static_argnames=("block_rows",))
def autoencoder_forward(x, w_enc, b_enc, w_dec, b_dec, *, block_rows=4096):
    """Forward of Linear(8,1) -> Linear(1,8).

    x:     [B, 8]
    w_enc: [8, 1]   (stored [in, out], i.e. transposed vs. PyTorch's [out, in])
    b_enc: [1, 1]
    w_dec: [1, 8]
    b_dec: [1, 8]
    Returns [B, 8] in x.dtype.
    """
    B, feat = x.shape
    assert feat == F
    out_dtype = x.dtype

    # ---- layer fusion (valid: no activation between encoder and decoder) ----
    w_f = w_enc.astype(jnp.float32) @ w_dec.astype(jnp.float32)            # (8, 8)
    b_f = (b_enc.astype(jnp.float32) @ w_dec.astype(jnp.float32)
           + b_dec.astype(jnp.float32))                                    # (1, 8)

    # Block-diagonal fused weight (128x128) + lane-tiled bias (1x128), f32.
    w_big = jnp.kron(jnp.eye(SAMPLES_PER_ROW, dtype=jnp.float32), w_f)     # (128, 128)
    b_big = jnp.tile(b_f, (1, SAMPLES_PER_ROW))                            # (1, 128)

    # ---- lane-dense flat view: (B,8) -> (R,128), no transpose ----
    b16 = _round_up(B, SAMPLES_PER_ROW)
    if b16 != B:
        # Only pads up to 15 rows; free when B is already a multiple of 16.
        x = jnp.pad(x, ((0, b16 - B), (0, 0)))
    r = b16 // SAMPLES_PER_ROW
    x_flat = x.reshape(r, 128)                                             # free reshape

    # Row tile: full array if it fits in one tile, else a multiple-of-8 tile
    # with a partial last grid step (B is NOT padded up to a full tile).
    if r <= block_rows:
        tr = r
    else:
        tr = _round_up(block_rows, 8)
    grid = (pl.cdiv(r, tr),)

    out_flat = pl.pallas_call(
        _fused_autoencoder_kernel,
        out_shape=jax.ShapeDtypeStruct((r, 128), out_dtype),
        grid_spec=pltpu.PrefetchScalarGridSpec(
            num_scalar_prefetch=0,
            grid=grid,
            in_specs=[
                pl.BlockSpec((tr, 128), lambda i: (i, 0)),     # x tiles (pipelined)
                pl.BlockSpec((128, 128), lambda i: (0, 0)),    # fused W, VMEM-resident
                pl.BlockSpec((1, 128), lambda i: (0, 0)),      # fused b, VMEM-resident
            ],
            out_specs=pl.BlockSpec((tr, 128), lambda i: (i, 0)),
        ),
        compiler_params=pltpu.CompilerParams(
            dimension_semantics=("parallel",),  # independent row tiles (v7x 2 TCs)
        ),
    )(x_flat, w_big, b_big)

    # Free reshape back + slice off the (at most 15) padded samples.
    return out_flat.reshape(b16, F)[:B].astype(out_dtype)


def init_params(key):
    # PyTorch nn.Linear default init: U(-1/sqrt(fan_in), 1/sqrt(fan_in)).
    k1, k2, k3, k4 = jax.random.split(key, 4)
    bound_enc = 1.0 / jnp.sqrt(8.0)   # encoder Linear(8, 1): fan_in = 8
    bound_dec = 1.0                   # decoder Linear(1, 8): fan_in = 1
    # Stored as [in, out] (transposed relative to PyTorch's [out, in]).
    w_enc = jax.random.uniform(k1, (8, 1), jnp.float32, -bound_enc, bound_enc)
    b_enc = jax.random.uniform(k2, (1, 1), jnp.float32, -bound_enc, bound_enc)
    w_dec = jax.random.uniform(k3, (1, 8), jnp.float32, -bound_dec, bound_dec)
    b_dec = jax.random.uniform(k4, (1, 8), jnp.float32, -bound_dec, bound_dec)
    return w_enc, b_enc, w_dec, b_dec


def _reference(x, w_enc, b_enc, w_dec, b_dec):
    # Unfused pure-JAX reference of the original two-layer forward.
    return (x @ w_enc + b_enc) @ w_dec + b_dec


if __name__ == "__main__":
    key = jax.random.PRNGKey(0)
    k_params, k_x, k_x2 = jax.random.split(key, 3)
    w_enc, b_enc, w_dec, b_dec = init_params(k_params)

    # Small demo batch consistent with the module (batch=2, features=8).
    x = jax.random.normal(k_x, (2, 8), jnp.float32)
    out = autoencoder_forward(x, w_enc, b_enc, w_dec, b_dec)
    out = jax.block_until_ready(out)
    ref = _reference(x, w_enc, b_enc, w_dec, b_dec)
    assert out.shape == (2, 8)
    assert jnp.allclose(out, ref, atol=2e-5, rtol=2e-5)

    # Secondary check exercising batch padding, multiple grid steps and a
    # partial last tile (B=300 -> 304 padded -> 19 rows, tiles of 8 rows).
    x2 = jax.random.normal(k_x2, (300, 8), jnp.float32)
    out2 = autoencoder_forward(x2, w_enc, b_enc, w_dec, b_dec, block_rows=8)
    out2 = jax.block_until_ready(out2)
    ref2 = _reference(x2, w_enc, b_enc, w_dec, b_dec)
    assert out2.shape == (300, 8)
    assert jnp.allclose(out2, ref2, atol=2e-5, rtol=2e-5)

    print("KERNEL_OK")
</pallas_src>

<mosaic_0001>
module attributes {stable_mosaic.version = 11 : i64} {
  func.func @_fused_autoencoder_kernel(%arg0: i32, %arg1: memref<1x128xf32, #tpu.memory_space<vmem>>, %arg2: memref<128x128xf32, #tpu.memory_space<vmem>>, %arg3: memref<1x128xf32, #tpu.memory_space<vmem>>, %arg4: memref<1x128xf32, #tpu.memory_space<vmem>>) attributes {dimension_semantics = [#tpu.dimension_semantics<parallel>], iteration_bounds = array<i64: 1>, scalar_prefetch = 0 : i64, scratch_operands = 0 : i64, tpu.core_type = #tpu.core_type<tc>, window_params = [{transform_indices = @transform_0, window_bounds = array<i64: 1, 128>}, {pipeline_mode = #tpu.pipeline_mode<synchronous>, transform_indices = @transform_1, window_bounds = array<i64: 128, 128>}, {pipeline_mode = #tpu.pipeline_mode<synchronous>, transform_indices = @transform_2, window_bounds = array<i64: 1, 128>}, {transform_indices = @transform_3, window_bounds = array<i64: 1, 128>}]} {
    %c0 = arith.constant 0 : index
    %c0_0 = arith.constant 0 : index
    %0 = vector.load %arg1[%c0, %c0_0] : memref<1x128xf32, #tpu.memory_space<vmem>>, vector<1x128xf32>
    %c0_1 = arith.constant 0 : index
    %c0_2 = arith.constant 0 : index
    %1 = vector.load %arg2[%c0_1, %c0_2] : memref<128x128xf32, #tpu.memory_space<vmem>>, vector<128x128xf32>
    %cst = arith.constant dense<0.000000e+00> : vector<1x128xf32>
    %2 = tpu.matmul %0, %1, %cst {dimension_numbers = #tpu.dot_dimension_numbers<[1], [0], [0], [1], [0, 0, 1, 1], [], []>} : vector<1x128xf32>, vector<128x128xf32>, vector<1x128xf32> -> vector<1x128xf32>
    %c0_3 = arith.constant 0 : index
    %c0_4 = arith.constant 0 : index
    %3 = vector.load %arg3[%c0_3, %c0_4] : memref<1x128xf32, #tpu.memory_space<vmem>>, vector<1x128xf32>
    %4 = arith.addf %2, %3 : vector<1x128xf32>
    %c0_5 = arith.constant 0 : index
    %c0_6 = arith.constant 0 : index
    %5 = vector.load %arg4[%c0_5, %c0_6] : memref<1x128xf32, #tpu.memory_space<vmem>>, vector<1x128xf32>
    tpu.vector_store %arg4[%c0_5, %c0_6], %4 {strides = array<i32>} : memref<1x128xf32, #tpu.memory_space<vmem>>, vector<1x128xf32>,
    return
  }
  func.func @transform_0(%arg0: i32) -> (i32, i32) {
    %c0_i32 = arith.constant 0 : i32
    %c0_i32_0 = arith.constant 0 : i32
    return %arg0, %c0_i32 : i32, i32
  }
  func.func @transform_1(%arg0: i32) -> (i32, i32) {
    %c0_i32 = arith.constant 0 : i32
    %c0_i32_0 = arith.constant 0 : i32
    %c0_i32_1 = arith.constant 0 : i32
    return %c0_i32, %c0_i32_0 : i32, i32
  }
  func.func @transform_2(%arg0: i32) -> (i32, i32) {
    %c0_i32 = arith.constant 0 : i32
    %c0_i32_0 = arith.constant 0 : i32
    %c0_i32_1 = arith.constant 0 : i32
    return %c0_i32, %c0_i32_0 : i32, i32
  }
  func.func @transform_3(%arg0: i32) -> (i32, i32) {
    %c0_i32 = arith.constant 0 : i32
    %c0_i32_0 = arith.constant 0 : i32
    return %arg0, %c0_i32 : i32, i32
  }
}

</mosaic_0001>

<bundles_post_ra>
// kernel: autoencoder_forward.1
= control target key start
LH: loop header
LB: loop body
LE: loop exit
PB: predicated region body
PF: predicated region fallthrough
CT: control target
= control target key end

     0   :  { %s134_s1 = inlined_call_operand.vmem [shape: f32[128,128], index: 1, kind: input, shape index: {}]   ;;  %s135_s0 = inlined_call_operand.vmem [shape: f32[1,128], index: 0, kind: input, shape index: {}]   ;;  %s136_s2 = inlined_call_operand.vmem [shape: f32[1,128], index: 2, kind: input, shape index: {}]   ;;  %s137_s3 = inlined_call_operand.vmem [shape: f32[1,128], index: 3, kind: output, shape index: {}]  }
   0x1   :  { %v30_v0 = vld [vmem:[%s134_s1 + $0x78] sm:$0xff]  ;;  %v29_v1 = vld [vmem:[%s134_s1 + $0x70] sm:$0xff]  ;;  %v28_v2 = vld [vmem:[%s134_s1 + $0x68] sm:$0xff] }
   0x2   :  { %32 = vmatpush.msra.mxu0 %v30_v0  ;;  %v27_v3 = vld [vmem:[%s134_s1 + $0x60] sm:$0xff]  ;;  %v26_v4 = vld [vmem:[%s134_s1 + $0x58] sm:$0xff]  ;;  %v25_v5 = vld [vmem:[%s134_s1 + $0x50] sm:$0xff] }
   0x3   :  { %v24_v6 = vld [vmem:[%s134_s1 + $0x48] sm:$0xff]  ;;  %v23_v7 = vld [vmem:[%s134_s1 + $0x40] sm:$0xff]  ;;  %v22_v8 = vld [vmem:[%s134_s1 + $0x38] sm:$0xff] }
   0x4   :  { %33 = vmatpush.msra.mxu0 %v29_v1  ;;  %v21_v9 = vld [vmem:[%s134_s1 + $0x30] sm:$0xff]  ;;  %v20_v10 = vld [vmem:[%s134_s1 + $0x28] sm:$0xff]  ;;  %v19_v11 = vld [vmem:[%s134_s1 + $0x20] sm:$0xff] }
   0x5   :  { %v18_v12 = vld [vmem:[%s134_s1 + $0x18] sm:$0xff]  ;;  %v17_v13 = vld [vmem:[%s134_s1 + $0x10] sm:$0xff]  ;;  %v16_v14 = vld [vmem:[%s134_s1 + $0x8] sm:$0xff] }
   0x6   :  { %34 = vmatpush.msra.mxu0 %v28_v2  ;;  %v15_v15 = vld [vmem:[%s134_s1] sm:$0xff] }
   0x7   :  { %v14_v16 = vld [vmem:[%s135_s0] sm:$0x1] }
   0x8   :  { %35 = vmatpush.msra.mxu0 %v27_v3  ;;  %v31_v17 = vld [vmem:[%s136_s2] sm:$0x1] }
   0xa   :  { %36 = vmatpush.msra.mxu0 %v26_v4 }
   0xc   :  { %37 = vmatpush.msra.mxu0 %v25_v5 }
   0xe   :  { %38 = vmatpush.msra.mxu0 %v24_v6 }
  0x10   :  { %39 = vmatpush.msra.mxu0 %v23_v7 }
  0x12   :  { %40 = vmatpush.msra.mxu0 %v22_v8 }
  0x14   :  { %41 = vmatpush.msra.mxu0 %v21_v9 }
  0x16   :  { %42 = vmatpush.msra.mxu0 %v20_v10 }
  0x18   :  { %43 = vmatpush.msra.mxu0 %v19_v11 }
  0x1a   :  { %44 = vmatpush.msra.mxu0 %v18_v12 }
  0x1c   :  { %45 = vmatpush.msra.mxu0 %v17_v13 }
  0x1e   :  { %46 = vmatpush.msra.mxu0 %v16_v14 }
  0x20   :  { %47 = vmatpush.msra.mxu0 %v15_v15 }
  0x21   :  { %48 = vmatmul.f32.vlgmr.msra.gmra.mxu0 %v14_v16 }
  0x9e   :  { %v49_v18 = vpop.f32.mrf.mxu0 }
  0x9f   :  { %v50_v19 = vadd.f32 %v49_v18, %v31_v17 }
  0xa1   :  { %52 = vst [vmem:[%s137_s3] sm:$0x1] %v50_v19 }

</bundles_post_ra>
